<compile_context>
chip_gen: v5e
topology: v5e:2x2
jax: 0.10.0
libtpu: 0.0.40
codegen_flags: <defaults>
</compile_context>

<pallas_src>
import functools

import jax
import jax.numpy as jnp
from jax.experimental import pallas as pl
from jax.experimental.pallas import tpu as pltpu

_LANE = 128        # lane width: atom axis maps to the 128-lane dimension
_MAX_TILE = 8192   # max atoms per grid step (128 KiB f32 block; VMEM-safe everywhere)


def _liquid_table_kernel(seed_ref, out_ref, *, box):
    """Build one transposed 'dataframe' tile.

    seed_ref : SMEM ref, shape (1,), int32  (scalar-prefetched seed)
    out_ref  : VMEM ref, shape (4, tile), float32
               row 0 = atom id (0-based), rows 1:4 = x, y, z in [0, box)
    """
    i = pl.program_id(0)
    rows, tile = out_ref.shape
    base = (i * tile).astype(jnp.uint32)          # first global atom id in tile
    seed = seed_ref[0].astype(jnp.uint32)

    # Global (row, atom) indices in the final lane-dense layout (pure VPU iota).
    lane = jax.lax.broadcasted_iota(jnp.uint32, (rows, tile), 1)
    row = jax.lax.broadcasted_iota(jnp.uint32, (rows, tile), 0)
    gid = base + lane                             # global atom index per lane

    # Stateless splitmix32-style hash of (seed, row, atom index): plain uint32
    # VPU ops (mul/xor/shift), no TPU-only PRNG primitives -> lowers on Mosaic
    # and in interpret mode.  Grid-sharding-invariant by construction.
    h = gid * jnp.uint32(0x9E3779B9)
    h = h ^ (row * jnp.uint32(0x85EBCA6B)) ^ seed
    h = h ^ (h >> 16)
    h = h * jnp.uint32(0x7FEB352D)
    h = h ^ (h >> 15)
    h = h * jnp.uint32(0x846CA68B)
    h = h ^ (h >> 16)

    # Top 24 bits -> uniform [0, box): single folded constant multiply.
    coords = (h >> 8).astype(jnp.float32) * jnp.float32(box / float(1 << 24))

    # Full-tile unmasked store of coords, then overwrite row 0 with 0-based
    # atom ids via a single 1-sublane store (cheaper than a 4-row where-select).
    out_ref[...] = coords
    ids = (base + jax.lax.broadcasted_iota(jnp.uint32, (1, tile), 1))
    # NOTE: ids exact as float32 only up to 2^24 atoms (fine for this use).
    out_ref[0:1, :] = ids.astype(jnp.float32)


def liquid_table_pallas(seed: jax.Array, n_atoms: int, box: float) -> jax.Array:
    """Pallas wrapper: int32 seed -> transposed atom table (4, n_atoms), f32."""
    # Pad the atom axis up to a lane multiple; slice back after the call.
    n_pad = ((n_atoms + _LANE - 1) // _LANE) * _LANE
    # Largest 128-multiple tile <= _MAX_TILE that divides the padded width.
    tile = min(n_pad, _MAX_TILE)
    while n_pad % tile != 0:
        tile -= _LANE
    grid = (n_pad // tile,)

    kernel = functools.partial(_liquid_table_kernel, box=float(box))
    table_t = pl.pallas_call(
        kernel,
        out_shape=jax.ShapeDtypeStruct((4, n_pad), jnp.float32),
        grid_spec=pltpu.PrefetchScalarGridSpec(
            num_scalar_prefetch=1,
            grid=grid,
            in_specs=[],
            out_specs=pl.BlockSpec((4, tile), lambda i, seed_ref: (0, i)),
        ),
        compiler_params=pltpu.CompilerParams(
            dimension_semantics=("parallel",),
        ),
    )(seed)
    return table_t[:, :n_atoms]


def replace_with_liquid_forward(x: jax.Array, key: jax.Array) -> jax.Array:
    """JAX equivalent of ReplaceWithLiquid.forward.

    `x` is accepted but (faithful to the reference) discarded; the result is a
    synthetic liquid-atom "dataframe" (n_atoms, 4) = [atom_id, x, y, z],
    generated deterministically from `key`.
    """
    del x  # reference forward ignores its input tensor entirely
    n_atoms = 256          # synthetic stand-in size (file-dependent in the ref)
    box = 4.0              # nm-ish box side, arbitrary
    seed = jax.random.randint(
        key, (1,), minval=0, maxval=jnp.iinfo(jnp.int32).max, dtype=jnp.int32
    )
    table_t = liquid_table_pallas(seed, n_atoms, box)   # (4, n_atoms) lane-dense
    return table_t.T                                    # (n_atoms, 4) row-major


if __name__ == "__main__":
    key = jax.random.PRNGKey(0)
    k_x, k_u = jax.random.split(key)

    # Example input consistent with an image-like transform pipeline (unused).
    x = jax.random.normal(k_x, (2, 4, 16, 16), dtype=jnp.float32)

    df = replace_with_liquid_forward(x, k_u)
    df = jax.block_until_ready(df)

    # Sanity checks: shape, dtype, atom-id column, coordinate range.
    assert df.shape == (256, 4)
    assert df.dtype == jnp.float32
    assert bool(jnp.allclose(df[:, 0], jnp.arange(256, dtype=jnp.float32)))
    assert bool(jnp.all((df[:, 1:] >= 0.0) & (df[:, 1:] < 4.0)))

    print("KERNEL_OK")
</pallas_src>

<mosaic_0001>
module attributes {stable_mosaic.version = 11 : i64} {
  func.func @_liquid_table_kernel(%arg0: i32, %arg1: memref<1xi32, #tpu.memory_space<smem>>, %arg2: memref<4x256xf32, #tpu.memory_space<vmem>>) attributes {dimension_semantics = [#tpu.dimension_semantics<parallel>], iteration_bounds = array<i64: 1>, scalar_prefetch = 1 : i64, scratch_operands = 0 : i64, tpu.core_type = #tpu.core_type<tc>, window_params = [{transform_indices = @transform_0, window_bounds = array<i64: 4, 256>}]} {
    %c256_i32 = arith.constant 256 : i32
    %0 = arith.muli %arg0, %c256_i32 : i32
    %c0 = arith.constant 0 : index
    %1 = memref.load %arg1[%c0] : memref<1xi32, #tpu.memory_space<smem>>
    %2 = tpu.iota {dimensions = array<i32: 1>} : vector<4x256xi32>
    %3 = tpu.iota {dimensions = array<i32: 0>} : vector<4x256xi32>
    %4 = vector.broadcast %0 : i32 to vector<4x256xi32>
    %5 = arith.addi %4, %2 : vector<4x256xi32>
    %c-1640531527_i32 = arith.constant -1640531527 : i32
    %6 = vector.broadcast %c-1640531527_i32 : i32 to vector<4x256xi32>
    %7 = arith.muli %5, %6 : vector<4x256xi32>
    %c-2048144789_i32 = arith.constant -2048144789 : i32
    %8 = vector.broadcast %c-2048144789_i32 : i32 to vector<4x256xi32>
    %9 = arith.muli %3, %8 : vector<4x256xi32>
    %10 = arith.xori %7, %9 : vector<4x256xi32>
    %11 = vector.broadcast %1 : i32 to vector<4x256xi32>
    %12 = arith.xori %10, %11 : vector<4x256xi32>
    %c16_i32 = arith.constant 16 : i32
    %13 = vector.broadcast %c16_i32 : i32 to vector<4x256xi32>
    %14 = arith.shrui %12, %13 : vector<4x256xi32>
    %15 = arith.xori %12, %14 : vector<4x256xi32>
    %c2146121005_i32 = arith.constant 2146121005 : i32
    %16 = vector.broadcast %c2146121005_i32 : i32 to vector<4x256xi32>
    %17 = arith.muli %15, %16 : vector<4x256xi32>
    %c15_i32 = arith.constant 15 : i32
    %18 = vector.broadcast %c15_i32 : i32 to vector<4x256xi32>
    %19 = arith.shrui %17, %18 : vector<4x256xi32>
    %20 = arith.xori %17, %19 : vector<4x256xi32>
    %c-2073254261_i32 = arith.constant -2073254261 : i32
    %21 = vector.broadcast %c-2073254261_i32 : i32 to vector<4x256xi32>
    %22 = arith.muli %20, %21 : vector<4x256xi32>
    %c16_i32_0 = arith.constant 16 : i32
    %23 = vector.broadcast %c16_i32_0 : i32 to vector<4x256xi32>
    %24 = arith.shrui %22, %23 : vector<4x256xi32>
    %25 = arith.xori %22, %24 : vector<4x256xi32>
    %c8_i32 = arith.constant 8 : i32
    %26 = vector.broadcast %c8_i32 : i32 to vector<4x256xi32>
    %27 = arith.shrui %25, %26 : vector<4x256xi32>
    %28 = arith.uitofp %27 : vector<4x256xi32> to vector<4x256xf32>
    %cst = arith.constant 2.38418579E-7 : f32
    %29 = vector.broadcast %cst : f32 to vector<4x256xf32>
    %30 = arith.mulf %28, %29 : vector<4x256xf32>
    %c0_1 = arith.constant 0 : index
    %c0_2 = arith.constant 0 : index
    %31 = vector.load %arg2[%c0_1, %c0_2] : memref<4x256xf32, #tpu.memory_space<vmem>>, vector<4x256xf32>
    tpu.vector_store %arg2[%c0_1, %c0_2], %30 {strides = array<i32>} : memref<4x256xf32, #tpu.memory_space<vmem>>, vector<4x256xf32>,
    %32 = tpu.iota {dimensions = array<i32: 1>} : vector<1x256xi32>
    %33 = vector.broadcast %0 : i32 to vector<1x256xi32>
    %34 = arith.addi %33, %32 : vector<1x256xi32>
    %35 = arith.uitofp %34 : vector<1x256xi32> to vector<1x256xf32>
    %c0_3 = arith.constant 0 : index
    %c0_4 = arith.constant 0 : index
    %36 = vector.load %arg2[%c0_3, %c0_4] : memref<4x256xf32, #tpu.memory_space<vmem>>, vector<1x256xf32>
    tpu.vector_store %arg2[%c0_3, %c0_4], %35 {strides = array<i32>} : memref<4x256xf32, #tpu.memory_space<vmem>>, vector<1x256xf32>,
    return
  }
  func.func @transform_0(%arg0: i32, %arg1: memref<1xi32, #tpu.memory_space<smem>>) -> (i32, i32) {
    %c0_i32 = arith.constant 0 : i32
    %c0_i32_0 = arith.constant 0 : i32
    return %c0_i32, %arg0 : i32, i32
  }
}

</mosaic_0001>

<bundles_post_ra>
// kernel: tpu_custom_call.1
= control target key start
LH: loop header
LB: loop body
LE: loop exit
PB: predicated region body
PF: predicated region fallthrough
CT: control target
= control target key end

     0   :  { %v10_v0 = vlaneseq  ;;  %s151_s0 = inlined_call_operand.<no memory space> [shape: s32[1], index: 0, kind: input, shape index: {}]   ;;  %s152_s1 = inlined_call_operand.hbm [shape: f32[4,256], index: 1, kind: output, shape index: {}]  }
   0x1   :  { %7 = vsyncpa [#allocation5], 0  ;;  %v23_v8 = vstv %s151_s0  ;;  %vm80_vm0 = vcmask 1040384   ;;  %vm61_vm1 = vcmask 1043456   ;;  %s131_s0 = smov [#allocation4]   ;;  %s95_s11 = sshll.u32 %s152_s1, 4  ;;  %s96_s11 = int_to_ptr.hbm [resolvable:$true] %s95_s11 }
   0x2   :  { %v11_v1 = vand.u32 127, %v10_v0  ;;  %v14_v2 = vshrl.u32 %v10_v0, 7  ;;  %s93_s8 = sshll.u32 %s131_s0, 4  ;;  %vm85_vm2 = vcmp.lt.s32.totalorder %v10_v0, 256  ;;  %s94_s8 = int_to_ptr.vmem [resolvable:$true] %s93_s8 }
   0x4   :  { %v12_v3 = vadd.s32 128, %v11_v1  ;;  %v18_v4 = vmul.u32 2654435769, %v11_v1  ;;  %v20_v5 = vmul.u32 2246822507, %v14_v2  ;;  %v65_v28 = vshrl.u32 %v11_v1, 16 }
   0x5   :  { %v66_v36 = vand.u32 65535, %v11_v1 }
   0x6   :  { %v19_v6 = vmul.u32 2654435769, %v12_v3  ;;  %v21_v7 = vxor.u32 %v20_v5, %v18_v4  ;;  %v71_v23 = vshrl.u32 %v12_v3, 16  ;;  %v72_v29 = vand.u32 65535, %v12_v3 }
   0x7   :  { %v67_v37 = vcvt.s32.f32 %v65_v28  ;;  %v69_v48 = vcvt.s32.f32 %v66_v36 }
   0x8   :  { %v22_v9 = vxor.u32 %v20_v5, %v19_v6  ;;  %v24_v10 = vxor.u32 %v23_v8, %v21_v7  ;;  %v73_v30 = vcvt.s32.f32 %v71_v23  ;;  %v75_v39 = vcvt.s32.f32 %v72_v29 }
   0x9   :  { %v68_v47 = vmul.f32 65536.0, %v67_v37 }
   0xa   :  { %v25_v11 = vxor.u32 %v23_v8, %v22_v9  ;;  %v26_v12 = vshrl.u32 %v24_v10, 16  ;;  %v74_v38 = vmul.f32 65536.0, %v73_v30 }
   0xb   :  { %v70_v53 = vadd.f32 %v69_v48, %v68_v47 }
   0xc   :  { %v27_v13 = vshrl.u32 %v25_v11, 16  ;;  %v28_v14 = vxor.u32 %v26_v12, %v24_v10  ;;  %v76_v49 = vadd.f32 %v75_v39, %v74_v38 }
   0xe   :  { %v29_v15 = vxor.u32 %v27_v13, %v25_v11  ;;  %v30_v16 = vmul.u32 2146121005, %v28_v14  ;;  %v79_v54 = vrot.slane %v76_v49, 7 }
  0x10   :  { %v31_v17 = vmul.u32 2146121005, %v29_v15  ;;  %v32_v18 = vshrl.u32 %v30_v16, 15  ;;  %v81_v58 = vsel %vm80_vm0, %v70_v53, %v79_v54 }
  0x12   :  { %v33_v19 = vshrl.u32 %v31_v17, 15  ;;  %v34_v20 = vxor.u32 %v32_v18, %v30_v16 }
  0x14   :  { %v35_v21 = vxor.u32 %v33_v19, %v31_v17  ;;  %v36_v22 = vmul.u32 2221713035, %v34_v20 }
  0x16   :  { %v37_v24 = vmul.u32 2221713035, %v35_v21  ;;  %v38_v25 = vshrl.u32 %v36_v22, 16 }
  0x18   :  { %v39_v26 = vshrl.u32 %v37_v24, 16  ;;  %v40_v27 = vxor.u32 %v38_v25, %v36_v22 }
  0x1a   :  { %v41_v31 = vxor.u32 %v39_v26, %v37_v24  ;;  %v42_v32 = vshrl.u32 %v40_v27, 8 }
  0x1c   :  { %v43_v33 = vshrl.u32 %v41_v31, 8  ;;  %v44_v34 = vshrl.u32 %v42_v32, 16  ;;  %v45_v35 = vand.u32 65535, %v42_v32 }
  0x1e   :  { %v46_v40 = vcvt.s32.f32 %v44_v34  ;;  %v48_v41 = vcvt.s32.f32 %v45_v35  ;;  %v50_v42 = vshrl.u32 %v43_v33, 16  ;;  %v51_v43 = vand.u32 65535, %v43_v33 }
  0x20   :  { %v47_v44 = vmul.f32 65536.0, %v46_v40  ;;  %v52_v45 = vcvt.s32.f32 %v50_v42  ;;  %v54_v46 = vcvt.s32.f32 %v51_v43 }
  0x22   :  { %v49_v50 = vadd.f32 %v48_v41, %v47_v44  ;;  %v53_v51 = vmul.f32 65536.0, %v52_v45 }
  0x24   :  { %v55_v52 = vadd.f32 %v54_v46, %v53_v51  ;;  %v56_v55 = vmul.f32 2.3841858e-07, %v49_v50 }
  0x26   :  { %v57_v56 = vmul.f32 2.3841858e-07, %v55_v52 }
  0x28   :  { %v60_v57 = vrot.slane %v57_v56, 4 }
  0x2a   :  { %v62_v59 = vsel %vm61_vm1, %v56_v55, %v60_v57 }
  0x2b   :  { %64 = vst [vmem:[#allocation4] sm:$0xff] %v62_v59 }
  0x2c   :  { %87 = vst.msk [vmem:[#allocation4] ss:$4 sm:$0x3] %vm85_vm2, %v81_v58 }
  0x2d   :  { %98 = dma.vmem_to_hbm [thread:$0]  %s94_s8, 128, %s96_s11, [#allocation5]  }
  0x2e   :  { %129 = dma.done.wait [#allocation5], 128  }
  0x2f   :  { %130 = vsyncadd [#allocation5], 4294967168 }
  0x30   :  { %103 = vsyncpa [#allocation5], 1 }

</bundles_post_ra>
